<compile_context>
chip_gen: v6e
topology: v6e:2x2x1
jax: 0.10.0
libtpu: 0.0.40
codegen_flags: <defaults>
</compile_context>

<pallas_src>
import math

import jax
import jax.numpy as jnp
from jax import lax
from jax.experimental import pallas as pl
from jax.experimental.pallas import tpu as pltpu

_LANE = 128      # vreg lane width: minimum lane-dense (unmasked-store) output width
_SUBLANE = 8


def _round_up(x, m):
    return ((x + m - 1) // m) * m


def _softplus(z):
    # Numerically stable softplus, matches torch.nn.Softplus (incl. large z).
    return jnp.maximum(z, 0.0) + jnp.log1p(jnp.exp(-jnp.abs(z)))


def _fold_blocks(weight):
    """(nIntPts, 6) raw params -> (3*nIntPts, 3) stacked wBlock_i = W_i^T W_i."""
    a = _softplus(weight[:, 0]); b = weight[:, 1]; c = weight[:, 2]
    d = _softplus(weight[:, 3]); e = weight[:, 4]; f = _softplus(weight[:, 5])
    row0 = jnp.stack([a * a, a * b, a * c], axis=-1)
    row1 = jnp.stack([a * b, b * b + d * d, b * c + d * e], axis=-1)
    row2 = jnp.stack([a * c, b * c + d * e, c * c + e * e + f * f], axis=-1)
    n = weight.shape[0]
    return jnp.stack([row0, row1, row2], axis=1).reshape(3 * n, 3)


def _vmem_capacity_bytes():
    try:
        return int(pltpu.get_tpu_info().vmem_capacity_bytes)
    except Exception:
        return 64 * 1024 * 1024   # conservative fallback = v7x per-TensorCore VMEM


def _choose_tiles(M, K, itemsize, vmem_cap, max_tk):
    """Pick (tm, tk): row tile sized by bytes, optional exact K tiling."""
    # K tiling only when a 128-multiple tile divides K exactly (a ragged K tile
    # would feed padding garbage into the reduction accumulator).
    tk = K
    if K > max_tk and K % _LANE == 0:
        tk = min(_round_up(max_tk, _LANE), K)
        while K % tk:
            tk -= _LANE

    # Row tile by bytes (~4 MiB per x buffer; the op is HBM-bandwidth bound),
    # shrunk until the whole double-buffered working set fits the per-core
    # VMEM budget (re-derived from live capacity: 64 MiB/TC on v7x).
    row_bytes = _round_up(tk, _LANE) * itemsize
    budget = max(vmem_cap // 2, 24 << 20)
    tm = max(_SUBLANE, ((4 << 20) // row_bytes) // _SUBLANE * _SUBLANE)

    def footprint(tm_):
        return (2 * tm_ * row_bytes                              # x (double-buffered)
                + 2 * _round_up(tk, _SUBLANE) * _LANE * itemsize  # weight tile
                + 2 * tm_ * _LANE * 4                             # out tile
                + tm_ * _LANE * 4)                                # f32 accumulator

    while tm > _SUBLANE and footprint(tm) > budget:
        tm = max(_SUBLANE, (tm // 2 // _SUBLANE) * _SUBLANE)

    if tm >= M:
        if M > _SUBLANE:
            # Keep >= 2 row tiles so dimension_semantics=("parallel", ...) can
            # shard the row axis across both v7x TensorCores.
            tm = _round_up(-(-M // 2), _SUBLANE)
        else:
            tm = M            # block == full dim (always legal)
    return tm, tk


def _block_dec_kernel(x_ref, w_ref, o_ref, acc_ref):
    # grid = (row tiles ["parallel"], K tiles ["arbitrary"; reduction axis last])
    @pl.when(pl.program_id(1) == 0)
    def _init():
        acc_ref[...] = jnp.zeros_like(acc_ref)

    acc_ref[...] += jnp.dot(
        x_ref[...], w_ref[...],
        preferred_element_type=jnp.float32,
        precision=lax.Precision.HIGHEST)   # match HIGHEST-precision reference

    @pl.when(pl.program_id(1) == pl.num_programs(1) - 1)
    def _store():
        o_ref[...] = acc_ref[...].astype(o_ref.dtype)


def block_dec_forward(x, weight, out_features, *, compute_dtype=None,
                      force_pallas=False, max_tk=2048):
    """x: (batch, in_features) or (in_features,); weight: (nIntPts, 6)."""
    squeeze = x.ndim == 1
    if squeeze:
        x = x[None, :]
    M, K = x.shape
    n = weight.shape[0]
    assert 3 * n <= K, "weight has more 3x3 blocks than in_features supports"
    assert out_features >= 3
    # TODO(synk): bias=True path not implemented — module default is bias=False
    # (its (in_features,)-shaped bias only broadcasts against the 3-wide block
    # output when in_features == 3).

    out_dtype = x.dtype
    cdtype = jnp.dtype(compute_dtype) if compute_dtype is not None else x.dtype
    itemsize = jnp.dtype(cdtype).itemsize
    wstack = _fold_blocks(weight).astype(cdtype)            # (3n, 3)

    # Fast path: fixed pallas_call/pipeline overhead dominates sub-tile problems.
    if not force_pallas and M * _round_up(K, _LANE) * itemsize < (1 << 20):
        out3 = jnp.dot(x[:, :3 * n].astype(cdtype), wstack,
                       precision=lax.Precision.HIGHEST).astype(out_dtype)
        out = jnp.zeros((M, out_features), out_dtype).at[:, :3].set(out3)
        return out[0] if squeeze else out

    x_c = x.astype(cdtype)
    # Only columns 0..2 are ever nonzero: build a single 128-lane weight slab.
    wslab = jnp.zeros((K, _LANE), cdtype).at[:3 * n, :3].set(wstack)

    vmem_cap = _vmem_capacity_bytes()
    tm, tk = _choose_tiles(M, K, itemsize, vmem_cap, max_tk)
    n_m = pl.cdiv(M, tm)
    n_k = pl.cdiv(K, tk)

    # Explicit VMEM budget: 2x x-tile + 2x weight tile + 2x out tile + accumulator.
    need = (2 * tm * _round_up(tk, _LANE) * itemsize
            + 2 * _round_up(tk, _SUBLANE) * _LANE * itemsize
            + 2 * tm * _LANE * jnp.dtype(out_dtype).itemsize
            + tm * _LANE * 4)
    vmem_limit = int(min(max(need + (2 << 20), 32 << 20),
                         max(vmem_cap - (8 << 20), 32 << 20)))

    def _call(single_buffer_weight):
        if single_buffer_weight:
            # Constant index_map -> weight is resident; a second pipeline
            # buffer is pure VMEM waste.
            w_spec = pl.BlockSpec((tk, _LANE), lambda i, k: (k, 0),
                                  pipeline_mode=pl.Buffered(1))
        else:
            w_spec = pl.BlockSpec((tk, _LANE), lambda i, k: (k, 0))
        return pl.pallas_call(
            _block_dec_kernel,
            out_shape=jax.ShapeDtypeStruct((M, _LANE), out_dtype),
            grid_spec=pltpu.PrefetchScalarGridSpec(
                num_scalar_prefetch=0,
                grid=(n_m, n_k),                              # reduction axis last
                in_specs=[
                    pl.BlockSpec((tm, tk), lambda i, k: (i, k)),   # x row tile
                    w_spec,                                         # weight slab
                ],
                out_specs=pl.BlockSpec((tm, _LANE), lambda i, k: (i, 0)),
                scratch_shapes=[pltpu.VMEM((tm, _LANE), jnp.float32)],
            ),
            compiler_params=pltpu.CompilerParams(
                dimension_semantics=("parallel", "arbitrary"),
                vmem_limit_bytes=vmem_limit),
        )(x_c, wslab)

    try:
        out128 = _call(single_buffer_weight=(n_k == 1))
    except Exception:
        # Fallback in case single-buffering is rejected by this jax version.
        out128 = _call(single_buffer_weight=False)

    if out_features == _LANE:
        out = out128
    elif out_features < _LANE:
        out = out128[:, :out_features]
    else:
        out = jnp.pad(out128, ((0, 0), (0, out_features - _LANE)))
    return out[0] if squeeze else out


def init_params(key, in_features, dtype=jnp.float32):
    """Deterministic init matching kaiming_uniform_(a=sqrt(5)) on (nIntPts, 6)."""
    n = in_features // 3
    bound = 1.0 / math.sqrt(6.0)  # fan_in = 6
    return jax.random.uniform(key, (n, 6), dtype, minval=-bound, maxval=bound)


def reference_forward(x, weight, out_features):
    """Faithful JAX port of the PyTorch loop (bias=False)."""
    squeeze = x.ndim == 1
    if squeeze:
        x = x[None, :]
    n = weight.shape[0]
    hi = lax.Precision.HIGHEST
    acc = jnp.zeros((x.shape[0], 3), x.dtype)
    for i in range(n):
        a = _softplus(weight[i, 0]); b = weight[i, 1]; c = weight[i, 2]
        d = _softplus(weight[i, 3]); e = weight[i, 4]; f = _softplus(weight[i, 5])
        zero = jnp.zeros((), x.dtype)
        W = jnp.stack([
            jnp.stack([a, b, c]),
            jnp.stack([zero, d, e]),
            jnp.stack([zero, zero, f]),
        ])
        wblock = jnp.matmul(W.T, W, precision=hi)
        acc = acc + jnp.matmul(x[:, 3 * i:3 * i + 3], wblock.T, precision=hi)
    out = jnp.zeros((x.shape[0], out_features), x.dtype).at[:, :3].set(acc)
    return out[0] if squeeze else out


if __name__ == "__main__":
    key = jax.random.PRNGKey(0)
    k1, k2, k3, k4 = jax.random.split(key, 4)

    # Case 1: tiny demo (batch=16, in_features=12 -> nIntPts=4, out_features=8).
    M1, K1, N1 = 16, 12, 8
    x1 = jax.random.normal(k1, (M1, K1), jnp.float32)
    w1 = init_params(k2, K1)
    out1 = jax.block_until_ready(block_dec_forward(x1, w1, N1, force_pallas=True))
    ref1 = reference_forward(x1, w1, N1)
    assert out1.shape == (M1, N1)
    assert jnp.allclose(out1, ref1, atol=1e-4, rtol=1e-4), "case 1 mismatch"
    # Default dispatch takes the tiny-problem XLA fast path — check it too.
    out1_fast = jax.block_until_ready(block_dec_forward(x1, w1, N1))
    assert jnp.allclose(out1_fast, ref1, atol=1e-4, rtol=1e-4), "fast-path mismatch"

    # Case 2: ragged row tiles, >= 2 grid steps, out_features > 128 (pad path).
    M2, K2, N2 = 300, 96, 136
    x2 = jax.random.normal(k3, (M2, K2), jnp.float32)
    w2 = init_params(k4, K2)
    out2 = jax.block_until_ready(block_dec_forward(x2, w2, N2, force_pallas=True))
    ref2 = reference_forward(x2, w2, N2)
    assert out2.shape == (M2, N2)
    assert jnp.allclose(out2, ref2, atol=1e-4, rtol=1e-4), "case 2 mismatch"

    # Case 3: K-tiled reduction grid (max_tk lowered so n_k > 1 at small shape),
    # ragged last row tile, in_features not a multiple of 3.
    M3, K3, N3 = 50, 256, 8
    kx, kw = jax.random.split(k1)
    x3 = jax.random.normal(kx, (M3, K3), jnp.float32)
    w3 = init_params(kw, K3)
    out3 = jax.block_until_ready(
        block_dec_forward(x3, w3, N3, force_pallas=True, max_tk=128))
    ref3 = reference_forward(x3, w3, N3)
    assert out3.shape == (M3, N3)
    assert jnp.allclose(out3, ref3, atol=1e-4, rtol=1e-4), "case 3 mismatch"

    # 1-D input path (batch_size == 1 branch of the torch module).
    outv = jax.block_until_ready(block_dec_forward(x1[0], w1, N1))
    assert outv.shape == (N1,)
    assert jnp.allclose(outv, ref1[0], atol=1e-4, rtol=1e-4), "1-D mismatch"

    print("KERNEL_OK")
</pallas_src>

<mosaic_0001>
module attributes {stable_mosaic.version = 11 : i64} {
  func.func @_block_dec_kernel(%arg0: i32, %arg1: i32, %arg2: memref<8x12xf32, #tpu.memory_space<vmem>>, %arg3: memref<12x128xf32, #tpu.memory_space<vmem>>, %arg4: memref<8x128xf32, #tpu.memory_space<vmem>>, %arg5: memref<8x128xf32, #tpu.memory_space<vmem>>) attributes {dimension_semantics = [#tpu.dimension_semantics<parallel>, #tpu.dimension_semantics<arbitrary>], iteration_bounds = array<i64: 2, 1>, scalar_prefetch = 0 : i64, scratch_operands = 1 : i64, tpu.core_type = #tpu.core_type<tc>, window_params = [{transform_indices = @transform_0, window_bounds = array<i64: 8, 12>}, {pipeline_mode = #tpu.pipeline_mode<synchronous>, transform_indices = @transform_1, window_bounds = array<i64: 12, 128>}, {transform_indices = @transform_2, window_bounds = array<i64: 8, 128>}]} {
    %c0_i32 = arith.constant 0 : i32
    %0 = arith.cmpi eq, %arg1, %c0_i32 : i32
    %1 = arith.extui %0 : i1 to i32
    %c0_i32_0 = arith.constant 0 : i32
    %2 = arith.cmpi ne, %1, %c0_i32_0 : i32
    scf.if %2 {
      %cst_10 = arith.constant 0.000000e+00 : f32
      %12 = vector.broadcast %cst_10 : f32 to vector<8x128xf32>
      %c0_11 = arith.constant 0 : index
      %c0_12 = arith.constant 0 : index
      %13 = vector.load %arg5[%c0_11, %c0_12] : memref<8x128xf32, #tpu.memory_space<vmem>>, vector<8x128xf32>
      tpu.vector_store %arg5[%c0_11, %c0_12], %12 {strides = array<i32>} : memref<8x128xf32, #tpu.memory_space<vmem>>, vector<8x128xf32>,
    } else {
    }
    %c0 = arith.constant 0 : index
    %c0_1 = arith.constant 0 : index
    %3 = vector.load %arg5[%c0, %c0_1] : memref<8x128xf32, #tpu.memory_space<vmem>>, vector<8x128xf32>
    %c0_2 = arith.constant 0 : index
    %c0_3 = arith.constant 0 : index
    %4 = vector.load %arg2[%c0_2, %c0_3] : memref<8x12xf32, #tpu.memory_space<vmem>>, vector<8x12xf32>
    %c0_4 = arith.constant 0 : index
    %c0_5 = arith.constant 0 : index
    %5 = vector.load %arg3[%c0_4, %c0_5] : memref<12x128xf32, #tpu.memory_space<vmem>>, vector<12x128xf32>
    %cst = arith.constant dense<0.000000e+00> : vector<8x128xf32>
    %6 = tpu.matmul %4, %5, %cst {dimension_numbers = #tpu.dot_dimension_numbers<[1], [0], [0], [1], [0, 0, 1, 1], [], []>, precision = #tpu.contract_precision<fp32>} : vector<8x12xf32>, vector<12x128xf32>, vector<8x128xf32> -> vector<8x128xf32>
    %7 = arith.addf %3, %6 : vector<8x128xf32>
    %c0_6 = arith.constant 0 : index
    %c0_7 = arith.constant 0 : index
    %8 = vector.load %arg5[%c0_6, %c0_7] : memref<8x128xf32, #tpu.memory_space<vmem>>, vector<8x128xf32>
    tpu.vector_store %arg5[%c0_6, %c0_7], %7 {strides = array<i32>} : memref<8x128xf32, #tpu.memory_space<vmem>>, vector<8x128xf32>,
    %c0_i32_8 = arith.constant 0 : i32
    %9 = arith.cmpi eq, %arg1, %c0_i32_8 : i32
    %10 = arith.extui %9 : i1 to i32
    %c0_i32_9 = arith.constant 0 : i32
    %11 = arith.cmpi ne, %10, %c0_i32_9 : i32
    scf.if %11 {
      %c0_10 = arith.constant 0 : index
      %c0_11 = arith.constant 0 : index
      %12 = vector.load %arg5[%c0_10, %c0_11] : memref<8x128xf32, #tpu.memory_space<vmem>>, vector<8x128xf32>
      %c0_12 = arith.constant 0 : index
      %c0_13 = arith.constant 0 : index
      %13 = vector.load %arg4[%c0_12, %c0_13] : memref<8x128xf32, #tpu.memory_space<vmem>>, vector<8x128xf32>
      tpu.vector_store %arg4[%c0_12, %c0_13], %12 {strides = array<i32>} : memref<8x128xf32, #tpu.memory_space<vmem>>, vector<8x128xf32>,
    } else {
    }
    return
  }
  func.func @transform_0(%arg0: i32, %arg1: i32) -> (i32, i32) {
    %c0_i32 = arith.constant 0 : i32
    return %arg0, %arg1 : i32, i32
  }
  func.func @transform_1(%arg0: i32, %arg1: i32) -> (i32, i32) {
    %c0_i32 = arith.constant 0 : i32
    %c0_i32_0 = arith.constant 0 : i32
    return %arg1, %c0_i32 : i32, i32
  }
  func.func @transform_2(%arg0: i32, %arg1: i32) -> (i32, i32) {
    %c0_i32 = arith.constant 0 : i32
    %c0_i32_0 = arith.constant 0 : i32
    return %arg0, %c0_i32 : i32, i32
  }
}

module attributes {stable_mosaic.version = 11 : i64} {
  func.func @_block_dec_kernel(%arg0: i32, %arg1: i32, %arg2: memref<8x12xf32, #tpu.memory_space<vmem>>, %arg3: memref<12x128xf32, #tpu.memory_space<vmem>>, %arg4: memref<8x128xf32, #tpu.memory_space<vmem>>, %arg5: memref<8x128xf32, #tpu.memory_space<vmem>>) attributes {dimension_semantics = [#tpu.dimension_semantics<parallel>, #tpu.dimension_semantics<arbitrary>], iteration_bounds = array<i64: 2, 1>, scalar_prefetch = 0 : i64, scratch_operands = 1 : i64, tpu.core_type = #tpu.core_type<tc>, window_params = [{transform_indices = @transform_0, window_bounds = array<i64: 8, 12>}, {transform_indices = @transform_1, window_bounds = array<i64: 12, 128>}, {transform_indices = @transform_2, window_bounds = array<i64: 8, 128>}]} {
    %c0_i32 = arith.constant 0 : i32
    %0 = arith.cmpi eq, %arg1, %c0_i32 : i32
    %1 = arith.extui %0 : i1 to i32
    %c0_i32_0 = arith.constant 0 : i32
    %2 = arith.cmpi ne, %1, %c0_i32_0 : i32
    scf.if %2 {
      %cst_10 = arith.constant 0.000000e+00 : f32
      %12 = vector.broadcast %cst_10 : f32 to vector<8x128xf32>
      %c0_11 = arith.constant 0 : index
      %c0_12 = arith.constant 0 : index
      %13 = vector.load %arg5[%c0_11, %c0_12] : memref<8x128xf32, #tpu.memory_space<vmem>>, vector<8x128xf32>
      tpu.vector_store %arg5[%c0_11, %c0_12], %12 {strides = array<i32>} : memref<8x128xf32, #tpu.memory_space<vmem>>, vector<8x128xf32>,
    } else {
    }
    %c0 = arith.constant 0 : index
    %c0_1 = arith.constant 0 : index
    %3 = vector.load %arg5[%c0, %c0_1] : memref<8x128xf32, #tpu.memory_space<vmem>>, vector<8x128xf32>
    %c0_2 = arith.constant 0 : index
    %c0_3 = arith.constant 0 : index
    %4 = vector.load %arg2[%c0_2, %c0_3] : memref<8x12xf32, #tpu.memory_space<vmem>>, vector<8x12xf32>
    %c0_4 = arith.constant 0 : index
    %c0_5 = arith.constant 0 : index
    %5 = vector.load %arg3[%c0_4, %c0_5] : memref<12x128xf32, #tpu.memory_space<vmem>>, vector<12x128xf32>
    %cst = arith.constant dense<0.000000e+00> : vector<8x128xf32>
    %6 = tpu.matmul %4, %5, %cst {dimension_numbers = #tpu.dot_dimension_numbers<[1], [0], [0], [1], [0, 0, 1, 1], [], []>, precision = #tpu.contract_precision<fp32>} : vector<8x12xf32>, vector<12x128xf32>, vector<8x128xf32> -> vector<8x128xf32>
    %7 = arith.addf %3, %6 : vector<8x128xf32>
    %c0_6 = arith.constant 0 : index
    %c0_7 = arith.constant 0 : index
    %8 = vector.load %arg5[%c0_6, %c0_7] : memref<8x128xf32, #tpu.memory_space<vmem>>, vector<8x128xf32>
    tpu.vector_store %arg5[%c0_6, %c0_7], %7 {strides = array<i32>} : memref<8x128xf32, #tpu.memory_space<vmem>>, vector<8x128xf32>,
    %c0_i32_8 = arith.constant 0 : i32
    %9 = arith.cmpi eq, %arg1, %c0_i32_8 : i32
    %10 = arith.extui %9 : i1 to i32
    %c0_i32_9 = arith.constant 0 : i32
    %11 = arith.cmpi ne, %10, %c0_i32_9 : i32
    scf.if %11 {
      %c0_10 = arith.constant 0 : index
      %c0_11 = arith.constant 0 : index
      %12 = vector.load %arg5[%c0_10, %c0_11] : memref<8x128xf32, #tpu.memory_space<vmem>>, vector<8x128xf32>
      %c0_12 = arith.constant 0 : index
      %c0_13 = arith.constant 0 : index
      %13 = vector.load %arg4[%c0_12, %c0_13] : memref<8x128xf32, #tpu.memory_space<vmem>>, vector<8x128xf32>
      tpu.vector_store %arg4[%c0_12, %c0_13], %12 {strides = array<i32>} : memref<8x128xf32, #tpu.memory_space<vmem>>, vector<8x128xf32>,
    } else {
    }
    return
  }
  func.func @transform_0(%arg0: i32, %arg1: i32) -> (i32, i32) {
    %c0_i32 = arith.constant 0 : i32
    return %arg0, %arg1 : i32, i32
  }
  func.func @transform_1(%arg0: i32, %arg1: i32) -> (i32, i32) {
    %c0_i32 = arith.constant 0 : i32
    %c0_i32_0 = arith.constant 0 : i32
    return %arg1, %c0_i32 : i32, i32
  }
  func.func @transform_2(%arg0: i32, %arg1: i32) -> (i32, i32) {
    %c0_i32 = arith.constant 0 : i32
    %c0_i32_0 = arith.constant 0 : i32
    return %arg0, %c0_i32 : i32, i32
  }
}

</mosaic_0001>

<bundles_post_ra>
// kernel: tpu_custom_call.1
= control target key start
LH: loop header
LB: loop body
LE: loop exit
PB: predicated region body
PF: predicated region fallthrough
CT: control target
= control target key end

     0   :  { %7 = vsyncpa [#allocation4], 0  ;;  %s1283_s0 = inlined_call_operand.hbm [shape: f32[16,12], index: 0, kind: input, shape index: {}]   ;;  %s1284_s1 = inlined_call_operand.hbm [shape: f32[12,128], index: 1, kind: input, shape index: {}]   ;;  %s1285_s2 = inlined_call_operand.hbm [shape: f32[16,128], index: 2, kind: output, shape index: {}]  }
   0x1   :  { %9 = vsyncpa [#allocation4 + $0x1], 0 }
   0x2   :  { %10 = vsyncpa [#allocation7], 0 }
   0x3   :  { %11 = vsyncpa [#allocation5], 0 }
   0x4   :  { %13 = vsyncpa [#allocation5 + $0x1], 0  ;;  %s1100_s9 = smov 0   ;;  %s1102_s10 = smov 0  }
   0x5   :  { %s1104_s11 = smov 0   ;;  %s1106_s12 = smov 0  }
   0x6   :  { %s1108_s13 = smov 0   ;;  %s1110_s14 = smov 0  }
   0x7 LB: > { %s786_s15 = sadd.s32 4294967295, %s1076_s14   ;;  %s787_s16 = sadd.s32 4294967294, %s1076_s14   ;;  %s1076_s14 = sphi %s1110_s14, %s19_s14   ;;  %s1072_s13 = sphi %s1108_s13, %s1303_s13   ;;  %s1068_s12 = sphi %s1106_s12, %s1302_s12   ;;  %s1064_s11 = sphi %s1104_s11, %s1301_s11   ;;  %s1060_s10 = sphi %s1102_s10, %s1300_s10   ;;  %s1056_s9 = sphi %s1100_s9, %s1299_s9  }
   0x8   : > { %p53_p0 = scmp.ne.s32.totalorder %s1060_s10, %s1056_s9  ;;  %p1134_p1 = scmp.eq.s32.totalorder %s786_s15, 0 }
   0x9   : > { %p1138_p2 = scmp.eq.s32.totalorder %s786_s15, 1  ;;  %p109_p3 = scmp.eq.s32.totalorder %s787_s16, 1 }
   0xa   : > { %p1144_p4 = por %p1134_p1, %p53_p0  ;;  %p788_p5 = scmp.ge.s32.totalorder %s1076_s14, 1 }
   0xb   : > { %p1149_p6 = por %p109_p3, %p53_p0  ;;  %p116_p7 = scmp.lt.s32.totalorder %s1076_s14, 3 }
   0xc   : > { %s1289_s19 = scalar_select %p1144_p4, 1, 0 }
   0xd   : > { %s1290_s20 = scalar_select %p1149_p6, 1, 0 }
   0xe   : > { %p1154_p8 = pnand %p788_p5, %p116_p7  ;;  %s1078_s22 = smov [#allocation6]  }
   0xf   : > { %s131_s23 = sshll.u32 %s1078_s22, 4  ;;  %s31_s25 = sadd.s32 1, %s1072_s13  ;;  %s132_s23 = int_to_ptr.vmem [resolvable:$true] %s131_s23 }
  0x10   : > { %p869_p9 = pneg %p1154_p8  ;;  %s949_s26 = scalar_lea.vmem %s132_s23, 256 }
  0x11   : > { %p950_p13 = scmp.ne.s32.totalorder %s132_s23, %s949_s26  ;;  %p957_p5 = scmp.lt.s32.totalorder %s132_s23, %s132_s23 }
  0x12   : > { %p1163_p11 = pnand %p869_p9, %p1134_p1  ;;  %p958_p7 = scmp.lt.s32.totalorder %s949_s26, %s949_s26 }
  0x14   : > { %p940_p12 = pneg %p1163_p11  ;;  %p959_p6 = por %p958_p7, %p957_p5 }
  0x16   : > { %p952_p0 = pnand %p950_p13, %p940_p12 }
  0x18   : > { %p953_p3 = pneg %p952_p0 }
  0x1a   : > { %p960_p4 = pnand %p959_p6, %p953_p3 }
  0x1c   : > { %963 = shalt.err (!%p960_p4)
}
  0x1d   : > { %s1079_s27 = smov 128   ;;  %s1080_s28 = smov 8  }
  0x1e   : > { %872 = dma.hbm_to_vmem [thread:$0]  (!%p1163_p11), %s1284_s1, 256, %s132_s23, [#allocation7], %s1079_s27, %s1079_s27, %s1080_s28  }
  0x1f   : > { %p33_p6 = scmp.ge.s32.totalorder %s31_s25, 2  ;;  %s40_s3 = sadd.s32 1, %s1064_s11 }
  0x20   : > { %p47_p4 = scmp.ne.s32.totalorder %s1064_s11, %s1060_s10  ;;  %p48_p9 = scmp.eq.s32.totalorder %s1076_s14, 0 }
  0x21   : > { %s1305_s25 = smov (%p33_p6, %s31_s25), 0  ;;  %p882_p0 = scmp.lt.s32.totalorder %s1076_s14, 2 }
  0x22   : > { %p1181_p12 = por %p48_p9, %p47_p4  ;;  %p1187_p13 = por %p1138_p2, %p47_p4 }
  0x23   : > { %s35_s6 = ssub.s32 %s1072_s13, %s1305_s25  ;;  %s145_s7 = sand.u32 1, %s1064_s11  }
  0x24   : > { %p38_p11 = scmp.eq.s32.totalorder %s35_s6, 0  ;;  %s791_s8 = sshll.u32 %s145_s7, 3 }
  0x25   : > { %s792_s16 = sshll.u32 %s1072_s13, 7  ;;  %s149_s26 = scalar_lea.vmem [#allocation3], %s791_s8 }
  0x26   : > { %s1196_s15 = scalar_select %p38_p11, %s1064_s11, %s40_s3  }
  0x27   : > { %s155_s24 = scalar_lea.hbm %s1283_s0, %s792_s16  ;;  %s157_s27 = sshll.u32 %s149_s26, 4  ;;  %s158_s27 = int_to_ptr.vmem [resolvable:$true] %s157_s27 }
  0x28   : > { %p1204_p2 = pnand %p882_p0, %p1181_p12  ;;  %s146_s28 = scalar_lea.sflag [#allocation4], %s145_s7 }
  0x29   : > { %s977_s29 = scalar_lea.vmem %s158_s27, 128  ;;  %s1081_s30 = smov [#allocation3]  }
  0x2a   : > { %p966_p3 = pneg %p1204_p2  ;;  %p978_p5 = scmp.ne.s32.totalorder %s158_s27, %s977_s29 }
  0x2b   : > { %s982_s3 = sshll.u32 %s1081_s30, 4  ;;  %s983_s3 = int_to_ptr.vmem [resolvable:$false] %s982_s3 }
  0x2c   : > { %p980_p7 = pnand %p978_p5, %p966_p3  ;;  %s984_s6 = scalar_lea.vmem %s983_s3, 256 }
  0x2d   : > { %p985_p4 = scmp.lt.s32.totalorder %s158_s27, %s983_s3  ;;  %p986_p9 = scmp.lt.s32.totalorder %s984_s6, %s977_s29 }
  0x2e   : > { %p981_p6 = pneg %p980_p7 }
  0x2f   : > { %p987_p11 = por %p986_p9, %p985_p4 }
  0x31   : > { %p988_p10 = pnand %p987_p11, %p981_p6 }
  0x33   : > { %991 = shalt.err (!%p988_p10)
}
  0x34   : > { %876 = dma.hbm_to_vmem [thread:$0]  (!%p1204_p2), %s155_s24, 128, %s158_s27, %s146_s28  }
  0x35   : > { %166 = sbr.rel (%p1154_p8) target bundleno = 296 (0x128), region = 28  ;;  %s1215_s4 = sand.u32 (!%p1154_p8), 1, %s1060_s10  }
  0x36   : > { %s794_s7 = sshll.u32 (!%p1154_p8), %s1215_s4, 3  ;;  %s169_s8 = scalar_lea.sflag (!%p1154_p8), [#allocation4], %s1215_s4 }
  0x37   : > { %s172_s16 = scalar_lea.vmem (!%p1154_p8), [#allocation3], %s794_s7  ;;  %p1296_p12 = scmp.ne.s32.totalorder (!%p1154_p8), %s1289_s19, 0 }
  0x3a   : > { %1043 = dma.done.wait (%p1296_p12), %s169_s8, 128  }
  0x3b   : > { %1045 = vsyncadd (%p1296_p12), %s169_s8, 4294967168 }
  0x3c   : > { %1047 = dma.done.wait (%p1134_p1), [#allocation7], 256  }
  0x3d   : > { %1049 = vsyncadd (%p1134_p1), [#allocation7], 4294967040  ;;  %v1082_v0 = vmov 0.0   ;;  %vm1083_vm0 = vmmov 0   ;;  %vm211_vm1 = vcmask 1043456   ;;  %vm207_vm2 = vcmask 97280  }
  0x3e   : > { %819 = vmatprep.subr.mxu0 %v1082_v0  ;;  %823 = vmatprep.mubr.msk.f32.mxu0 %vm1083_vm0, %v1082_v0  ;;  %v206_v1 = vld [vmem:[#allocation6 + $0x8] sm:$0xf]  ;;  %v205_v2 = vld [vmem:[#allocation6] sm:$0xff]  ;;  %v204_v3 = vld [vmem:[%s172_s16] sm:$0xff]  ;;  %s798_s17 = sshll.u32 %s1068_s12, 7  ;;  %s196_s19 = scalar_lea.vmem [#allocation8], %s794_s7 }
  0x3f   : > { %826 = vmatprep.subr.mxu1 %v1082_v0  ;;  %830 = vmatprep.mubr.msk.f32.mxu1 %vm1083_vm0, %v1082_v0  ;;  %v213_v4 = vsel %vm211_vm1, %v206_v1, 0  ;;  %v247_v5 = vand.u32 4294901760, %v205_v2  ;;  %v209_v6 = vsel %vm207_vm2, %v204_v3, 0  ;;  %s695_s21 = sshll.u32 %s196_s19, 4  ;;  %s1241_s24 = scalar_lea.hbm %s1285_s2, %s798_s17  ;;  %s696_s21 = int_to_ptr.vmem [resolvable:$true] %s695_s21 }
  0x40   : > { %v244_v7 = vand.u32 4294901760, %v213_v4  ;;  %v282_v8 = vand.u32 4294901760, %v209_v6  ;;  %s682_s26 = scalar_lea.sflag [#allocation5], %s1215_s4  ;;  %s992_s27 = scalar_lea.vmem %s696_s21, 128 }
  0x41   : > { %v329_v9 = vsub.f32 %v205_v2, %v247_v5  ;;  %p993_p1 = scmp.ne.s32.totalorder %s696_s21, %s992_s27  ;;  %s1084_s12 = smov [#allocation8]  }
  0x42   : > { %820 = vmatpush3.msra.mxu0 %v244_v7  ;;  %v283_v10 = vsub.f32 %v209_v6, %v282_v8  ;;  %v322_v11 = vsub.f32 %v213_v4, %v244_v7  ;;  %s996_s18 = sshll.u32 %s1084_s12, 4  ;;  %s997_s18 = int_to_ptr.vmem [resolvable:$false] %s996_s18 }
  0x43   : > { %821 = vmatprep.subr.mxu0 %v1082_v0  ;;  %v330_v12 = vand.u32 4294901760, %v329_v9  ;;  %p994_p8 = pnand %p993_p1, %p1187_p13  ;;  %s998_s28 = scalar_lea.vmem %s997_s18, 256 }
  0x44   : > { %822 = vmatpush3.msra.mxu0 %v247_v5  ;;  %v284_v13 = vand.u32 4294901760, %v283_v10  ;;  %v323_v14 = vand.u32 4294901760, %v322_v11  ;;  %p999_p0 = scmp.lt.s32.totalorder %s696_s21, %s997_s18  ;;  %p1000_p2 = scmp.lt.s32.totalorder %s998_s28, %s992_s27 }
  0x45   : > { %833 = vmatprep.subr.mxu0 %v1082_v0  ;;  %v331_v15 = vsub.f32 %v329_v9, %v330_v12  ;;  %p995_p10 = pneg %p994_p8 }
  0x46   : > { %v285_v16 = vsub.f32 %v283_v10, %v284_v13  ;;  %v324_v17 = vsub.f32 %v322_v11, %v323_v14  ;;  %p1001_p3 = por %p1000_p2, %p999_p0 }
  0x47   : > { %v332_v20 = vand.u32 4294901760, %v331_v15 }
  0x48   : > { %v286_v18 = vand.u32 4294901760, %v285_v16  ;;  %v325_v19 = vand.u32 4294901760, %v324_v17  ;;  %p1002_p5 = pnand %p1001_p3, %p995_p10 }
  0x4a   : > { %824 = vmatmul.mubr.f32.vlgmr.msra.gmra.mxu0 %v286_v18  ;;  %827 = vmatpush3.msra.mxu1 %v325_v19 }
  0x4b   : > { %828 = vmatprep.subr.mxu1 %v1082_v0  ;;  %834 = vmatpush3.msra.mxu0 %v322_v11 }
  0x4c   : > { %829 = vmatpush3.msra.mxu1 %v332_v20  ;;  %835 = vmatprep.subr.mxu0 %v1082_v0 }
  0x4d   : > { %831 = vmatmul.mubr.f32.vlgmr.msra.gmra.mxu1 %v282_v8  ;;  %836 = vmatpush3.msra.mxu0 %v329_v9 }
  0x4e   : > { %837 = vmatprep.mubr.msk.f32.mxu0 %vm1083_vm0, %v1082_v0  ;;  %840 = vmatprep.subr.mxu1 %v1082_v0 }
  0x4f   : > { %838 = vmatmul.mubr.f32.vlgmr.msra.gmra.mxu0 %v283_v10  ;;  %841 = vmatpush3.msra.mxu1 %v244_v7 }
  0x50   : > { %847 = vmatprep.subr.mxu0 %v1082_v0  ;;  %842 = vmatprep.subr.mxu1 %v1082_v0 }
  0x51   : > { %848 = vmatpush3.msra.mxu0 %v323_v14  ;;  %843 = vmatpush3.msra.mxu1 %v247_v5 }
  0x52   : > { %844 = vmatprep.mubr.msk.f32.mxu1 %vm1083_vm0, %v1082_v0  ;;  %849 = vmatprep.subr.mxu0 %v1082_v0 }
  0x53   : > { %845 = vmatmul.mubr.f32.vlgmr.msra.gmra.mxu1 %v284_v13  ;;  %850 = vmatpush3.msra.mxu0 %v330_v12 }
  0x54   : > { %851 = vmatprep.mubr.msk.f32.mxu0 %vm1083_vm0, %v1082_v0  ;;  %854 = vmatprep.subr.mxu1 %v1082_v0 }
  0x55   : > { %852 = vmatmul.mubr.f32.vlgmr.msra.gmra.mxu0 %v282_v8  ;;  %855 = vmatpush3.msra.mxu1 %v244_v7 }
  0x56   : > { %856 = vmatprep.subr.mxu1 %v1082_v0  ;;  %858 = vmatprep.mubr.msk.f32.mxu1 %vm1083_vm0, %v1082_v0 }
  0x57   : > { %857 = vmatpush3.msra.mxu1 %v247_v5 }
  0x58   : > { %859 = vmatmul.mubr.f32.vlgmr.msra.gmra.mxu1 %v282_v8 }
 0x10a   : > { %v288_v21 = vpop.f32.mrf.mxu0 }
 0x10c   : > { %v825_v22 = vpop.f32.mrf.mxu0 }
 0x10d   : > { %v369_v23 = vpop.f32.mrf.mxu1 }
 0x10e   : > { %v370_v24 = vadd.f32 %v369_v23, %v288_v21 }
 0x10f   : > { %v445_v25 = vpop.f32.mrf.mxu0  ;;  %v832_v26 = vpop.f32.mrf.mxu1 }
 0x110   : > { %v446_v27 = vadd.f32 %v445_v25, %v370_v24 }
 0x111   : > { %v839_v28 = vpop.f32.mrf.mxu0 }
 0x113   : > { %v520_v29 = vpop.f32.mrf.mxu1 }
 0x114   : > { %v521_v30 = vadd.f32 %v520_v29, %v446_v27 }
 0x115   : > { %v597_v31 = vpop.f32.mrf.mxu0  ;;  %v846_v32 = vpop.f32.mrf.mxu1 }
 0x116   : > { %v598_v33 = vadd.f32 %v597_v31, %v521_v30 }
 0x117   : > { %v853_v34 = vpop.f32.mrf.mxu0 }
 0x118   : > { %v670_v35 = vpop.f32.mrf.mxu1 }
 0x119   : > { %v671_v36 = vadd.f32 %v670_v35, %v598_v33 }
 0x11a   : > { %v860_v37 = vpop.f32.mrf.mxu1 }
 0x11b   : > { %680 = vst [vmem:[%s196_s19] sm:$0xff] %v671_v36 }
 0x11c   : > { %1005 = shalt.err (!%p1002_p5)
}
 0x11d   : > { %s1006_s29 = scalar_lea.hbm %s1241_s24, 128  ;;  %s1010_s6 = scalar_lea.hbm %s1285_s2, 256 }
 0x11e   : > { %p1007_p7 = scmp.ne.s32.totalorder %s1241_s24, %s1006_s29  ;;  %p1011_p9 = scmp.lt.s32.totalorder %s1241_s24, %s1285_s2 }
 0x11f   : > { %p1012_p11 = scmp.lt.s32.totalorder %s1010_s6, %s1006_s29 }
 0x120   : > { %p1008_p6 = pnand %p1007_p7, %p1187_p13 }
 0x121   : > { %p1013_p12 = por %p1012_p11, %p1011_p9 }
 0x122   : > { %p1009_p4 = pneg %p1008_p6 }
 0x124   : > { %p1014_p1 = pnand %p1013_p12, %p1009_p4 }
 0x126   : > { %1017 = shalt.err (!%p1014_p1)
}
 0x127   : > { %867 = dma.vmem_to_hbm [thread:$0]  (%p1187_p13), %s696_s21, 128, %s1241_s24, %s682_s26  }
 0x128 PF: > { %s707_s8 = sand.u32 1, %s1056_s9   ;;  %p1297_p8 = scmp.ne.s32.totalorder %s1290_s20, 0 }
 0x129   : > { %p1298_p10 = scmp.ge.s32.totalorder %s1076_s14, 2  ;;  %s708_s16 = scalar_lea.sflag [#allocation5], %s707_s8 }
 0x12b   : > { %p878_p0 = pnand %p1298_p10, %p1297_p8 }
 0x12d   : > { %p879_p2 = pneg %p878_p0 }
 0x12f   : > { %1051 = dma.done.wait (%p879_p2), %s708_s16, 128  }
 0x130   : > { %1053 = vsyncadd (%p879_p2), %s708_s16, 4294967168  ;;  %s19_s14 = sadd.s32 1, %s1076_s14   ;;  %s1299_s9 = smov %s1060_s10 }
 0x131   : > { %p16_p3 = scmp.ge.s32.totalorder %s19_s14, 4   ;;  %s1300_s10 = smov %s1064_s11 }
 0x132   : > { %s1301_s11 = smov %s1196_s15  ;;  %s1302_s12 = smov %s1072_s13 }
 0x133   : > { %s1303_s13 = smov %s1305_s25  ;;  %18 = sbr.rel (!%p16_p3) target bundleno = 7 (0x7), region = 86 }
 0x138   :  { %713 = vsyncpa [#allocation4], 1 }
 0x139   :  { %715 = vsyncpa [#allocation4 + $0x1], 1 }
 0x13a   :  { %716 = vsyncpa [#allocation7], 1 }
 0x13b   :  { %717 = vsyncpa [#allocation5], 1 }
 0x13c   :  { %719 = vsyncpa [#allocation5 + $0x1], 1 }

// kernel: tpu_custom_call.1
= control target key start
LH: loop header
LB: loop body
LE: loop exit
PB: predicated region body
PF: predicated region fallthrough
CT: control target
= control target key end

     0   :  { %7 = vsyncpa [#allocation4], 0  ;;  %s1283_s0 = inlined_call_operand.hbm [shape: f32[16,12], index: 0, kind: input, shape index: {}]   ;;  %s1284_s1 = inlined_call_operand.hbm [shape: f32[12,128], index: 1, kind: input, shape index: {}]   ;;  %s1285_s2 = inlined_call_operand.hbm [shape: f32[16,128], index: 2, kind: output, shape index: {}]  }
   0x1   :  { %9 = vsyncpa [#allocation4 + $0x1], 0 }
   0x2   :  { %10 = vsyncpa [#allocation7], 0 }
   0x3   :  { %11 = vsyncpa [#allocation5], 0 }
   0x4   :  { %13 = vsyncpa [#allocation5 + $0x1], 0  ;;  %s1100_s9 = smov 0   ;;  %s1102_s10 = smov 0  }
   0x5   :  { %s1104_s11 = smov 0   ;;  %s1106_s12 = smov 0  }
   0x6   :  { %s1108_s13 = smov 0   ;;  %s1110_s14 = smov 0  }
   0x7 LB: > { %s786_s15 = sadd.s32 4294967295, %s1076_s14   ;;  %s787_s16 = sadd.s32 4294967294, %s1076_s14   ;;  %s1076_s14 = sphi %s1110_s14, %s19_s14   ;;  %s1072_s13 = sphi %s1108_s13, %s1303_s13   ;;  %s1068_s12 = sphi %s1106_s12, %s1302_s12   ;;  %s1064_s11 = sphi %s1104_s11, %s1301_s11   ;;  %s1060_s10 = sphi %s1102_s10, %s1300_s10   ;;  %s1056_s9 = sphi %s1100_s9, %s1299_s9  }
   0x8   : > { %p53_p0 = scmp.ne.s32.totalorder %s1060_s10, %s1056_s9  ;;  %p1134_p1 = scmp.eq.s32.totalorder %s786_s15, 0 }
   0x9   : > { %p1138_p2 = scmp.eq.s32.totalorder %s786_s15, 1  ;;  %p109_p3 = scmp.eq.s32.totalorder %s787_s16, 1 }
   0xa   : > { %p1144_p4 = por %p1134_p1, %p53_p0  ;;  %p788_p5 = scmp.ge.s32.totalorder %s1076_s14, 1 }
   0xb   : > { %p1149_p6 = por %p109_p3, %p53_p0  ;;  %p116_p7 = scmp.lt.s32.totalorder %s1076_s14, 3 }
   0xc   : > { %s1289_s19 = scalar_select %p1144_p4, 1, 0 }
   0xd   : > { %s1290_s20 = scalar_select %p1149_p6, 1, 0 }
   0xe   : > { %p1154_p8 = pnand %p788_p5, %p116_p7  ;;  %s1078_s22 = smov [#allocation6]  }
   0xf   : > { %s131_s23 = sshll.u32 %s1078_s22, 4  ;;  %s31_s25 = sadd.s32 1, %s1072_s13  ;;  %s132_s23 = int_to_ptr.vmem [resolvable:$true] %s131_s23 }
  0x10   : > { %p869_p9 = pneg %p1154_p8  ;;  %s949_s26 = scalar_lea.vmem %s132_s23, 256 }
  0x11   : > { %p950_p13 = scmp.ne.s32.totalorder %s132_s23, %s949_s26  ;;  %p957_p5 = scmp.lt.s32.totalorder %s132_s23, %s132_s23 }
  0x12   : > { %p1163_p11 = pnand %p869_p9, %p1134_p1  ;;  %p958_p7 = scmp.lt.s32.totalorder %s949_s26, %s949_s26 }
  0x14   : > { %p940_p12 = pneg %p1163_p11  ;;  %p959_p6 = por %p958_p7, %p957_p5 }
  0x16   : > { %p952_p0 = pnand %p950_p13, %p940_p12 }
  0x18   : > { %p953_p3 = pneg %p952_p0 }
  0x1a   : > { %p960_p4 = pnand %p959_p6, %p953_p3 }
  0x1c   : > { %963 = shalt.err (!%p960_p4)
}
  0x1d   : > { %s1079_s27 = smov 128   ;;  %s1080_s28 = smov 8  }
  0x1e   : > { %872 = dma.hbm_to_vmem [thread:$0]  (!%p1163_p11), %s1284_s1, 256, %s132_s23, [#allocation7], %s1079_s27, %s1079_s27, %s1080_s28  }
  0x1f   : > { %p33_p6 = scmp.ge.s32.totalorder %s31_s25, 2  ;;  %s40_s3 = sadd.s32 1, %s1064_s11 }
  0x20   : > { %p47_p4 = scmp.ne.s32.totalorder %s1064_s11, %s1060_s10  ;;  %p48_p9 = scmp.eq.s32.totalorder %s1076_s14, 0 }
  0x21   : > { %s1305_s25 = smov (%p33_p6, %s31_s25), 0  ;;  %p882_p0 = scmp.lt.s32.totalorder %s1076_s14, 2 }
  0x22   : > { %p1181_p12 = por %p48_p9, %p47_p4  ;;  %p1187_p13 = por %p1138_p2, %p47_p4 }
  0x23   : > { %s35_s6 = ssub.s32 %s1072_s13, %s1305_s25  ;;  %s145_s7 = sand.u32 1, %s1064_s11  }
  0x24   : > { %p38_p11 = scmp.eq.s32.totalorder %s35_s6, 0  ;;  %s791_s8 = sshll.u32 %s145_s7, 3 }
  0x25   : > { %s792_s16 = sshll.u32 %s1072_s13, 7  ;;  %s149_s26 = scalar_lea.vmem [#allocation3], %s791_s8 }
  0x26   : > { %s1196_s15 = scalar_select %p38_p11, %s1064_s11, %s40_s3  }
  0x27   : > { %s155_s24 = scalar_lea.hbm %s1283_s0, %s792_s16  ;;  %s157_s27 = sshll.u32 %s149_s26, 4  ;;  %s158_s27 = int_to_ptr.vmem [resolvable:$true] %s157_s27 }
  0x28   : > { %p1204_p2 = pnand %p882_p0, %p1181_p12  ;;  %s146_s28 = scalar_lea.sflag [#allocation4], %s145_s7 }
  0x29   : > { %s977_s29 = scalar_lea.vmem %s158_s27, 128  ;;  %s1081_s30 = smov [#allocation3]  }
  0x2a   : > { %p966_p3 = pneg %p1204_p2  ;;  %p978_p5 = scmp.ne.s32.totalorder %s158_s27, %s977_s29 }
  0x2b   : > { %s982_s3 = sshll.u32 %s1081_s30, 4  ;;  %s983_s3 = int_to_ptr.vmem [resolvable:$false] %s982_s3 }
  0x2c   : > { %p980_p7 = pnand %p978_p5, %p966_p3  ;;  %s984_s6 = scalar_lea.vmem %s983_s3, 256 }
  0x2d   : > { %p985_p4 = scmp.lt.s32.totalorder %s158_s27, %s983_s3  ;;  %p986_p9 = scmp.lt.s32.totalorder %s984_s6, %s977_s29 }
  0x2e   : > { %p981_p6 = pneg %p980_p7 }
  0x2f   : > { %p987_p11 = por %p986_p9, %p985_p4 }
  0x31   : > { %p988_p10 = pnand %p987_p11, %p981_p6 }
  0x33   : > { %991 = shalt.err (!%p988_p10)
}
  0x34   : > { %876 = dma.hbm_to_vmem [thread:$0]  (!%p1204_p2), %s155_s24, 128, %s158_s27, %s146_s28  }
  0x35   : > { %166 = sbr.rel (%p1154_p8) target bundleno = 296 (0x128), region = 28  ;;  %s1215_s4 = sand.u32 (!%p1154_p8), 1, %s1060_s10  }
  0x36   : > { %s794_s7 = sshll.u32 (!%p1154_p8), %s1215_s4, 3  ;;  %s169_s8 = scalar_lea.sflag (!%p1154_p8), [#allocation4], %s1215_s4 }
  0x37   : > { %s172_s16 = scalar_lea.vmem (!%p1154_p8), [#allocation3], %s794_s7  ;;  %p1296_p12 = scmp.ne.s32.totalorder (!%p1154_p8), %s1289_s19, 0 }
  0x3a   : > { %1043 = dma.done.wait (%p1296_p12), %s169_s8, 128  }
  0x3b   : > { %1045 = vsyncadd (%p1296_p12), %s169_s8, 4294967168 }
  0x3c   : > { %1047 = dma.done.wait (%p1134_p1), [#allocation7], 256  }
  0x3d   : > { %1049 = vsyncadd (%p1134_p1), [#allocation7], 4294967040  ;;  %v1082_v0 = vmov 0.0   ;;  %vm1083_vm0 = vmmov 0   ;;  %vm211_vm1 = vcmask 1043456   ;;  %vm207_vm2 = vcmask 97280  }
  0x3e   : > { %819 = vmatprep.subr.mxu0 %v1082_v0  ;;  %823 = vmatprep.mubr.msk.f32.mxu0 %vm1083_vm0, %v1082_v0  ;;  %v206_v1 = vld [vmem:[#allocation6 + $0x8] sm:$0xf]  ;;  %v205_v2 = vld [vmem:[#allocation6] sm:$0xff]  ;;  %v204_v3 = vld [vmem:[%s172_s16] sm:$0xff]  ;;  %s798_s17 = sshll.u32 %s1068_s12, 7  ;;  %s196_s19 = scalar_lea.vmem [#allocation8], %s794_s7 }
  0x3f   : > { %826 = vmatprep.subr.mxu1 %v1082_v0  ;;  %830 = vmatprep.mubr.msk.f32.mxu1 %vm1083_vm0, %v1082_v0  ;;  %v213_v4 = vsel %vm211_vm1, %v206_v1, 0  ;;  %v247_v5 = vand.u32 4294901760, %v205_v2  ;;  %v209_v6 = vsel %vm207_vm2, %v204_v3, 0  ;;  %s695_s21 = sshll.u32 %s196_s19, 4  ;;  %s1241_s24 = scalar_lea.hbm %s1285_s2, %s798_s17  ;;  %s696_s21 = int_to_ptr.vmem [resolvable:$true] %s695_s21 }
  0x40   : > { %v244_v7 = vand.u32 4294901760, %v213_v4  ;;  %v282_v8 = vand.u32 4294901760, %v209_v6  ;;  %s682_s26 = scalar_lea.sflag [#allocation5], %s1215_s4  ;;  %s992_s27 = scalar_lea.vmem %s696_s21, 128 }
  0x41   : > { %v329_v9 = vsub.f32 %v205_v2, %v247_v5  ;;  %p993_p1 = scmp.ne.s32.totalorder %s696_s21, %s992_s27  ;;  %s1084_s12 = smov [#allocation8]  }
  0x42   : > { %820 = vmatpush3.msra.mxu0 %v244_v7  ;;  %v283_v10 = vsub.f32 %v209_v6, %v282_v8  ;;  %v322_v11 = vsub.f32 %v213_v4, %v244_v7  ;;  %s996_s18 = sshll.u32 %s1084_s12, 4  ;;  %s997_s18 = int_to_ptr.vmem [resolvable:$false] %s996_s18 }
  0x43   : > { %821 = vmatprep.subr.mxu0 %v1082_v0  ;;  %v330_v12 = vand.u32 4294901760, %v329_v9  ;;  %p994_p8 = pnand %p993_p1, %p1187_p13  ;;  %s998_s28 = scalar_lea.vmem %s997_s18, 256 }
  0x44   : > { %822 = vmatpush3.msra.mxu0 %v247_v5  ;;  %v284_v13 = vand.u32 4294901760, %v283_v10  ;;  %v323_v14 = vand.u32 4294901760, %v322_v11  ;;  %p999_p0 = scmp.lt.s32.totalorder %s696_s21, %s997_s18  ;;  %p1000_p2 = scmp.lt.s32.totalorder %s998_s28, %s992_s27 }
  0x45   : > { %833 = vmatprep.subr.mxu0 %v1082_v0  ;;  %v331_v15 = vsub.f32 %v329_v9, %v330_v12  ;;  %p995_p10 = pneg %p994_p8 }
  0x46   : > { %v285_v16 = vsub.f32 %v283_v10, %v284_v13  ;;  %v324_v17 = vsub.f32 %v322_v11, %v323_v14  ;;  %p1001_p3 = por %p1000_p2, %p999_p0 }
  0x47   : > { %v332_v20 = vand.u32 4294901760, %v331_v15 }
  0x48   : > { %v286_v18 = vand.u32 4294901760, %v285_v16  ;;  %v325_v19 = vand.u32 4294901760, %v324_v17  ;;  %p1002_p5 = pnand %p1001_p3, %p995_p10 }
  0x4a   : > { %824 = vmatmul.mubr.f32.vlgmr.msra.gmra.mxu0 %v286_v18  ;;  %827 = vmatpush3.msra.mxu1 %v325_v19 }
  0x4b   : > { %828 = vmatprep.subr.mxu1 %v1082_v0  ;;  %834 = vmatpush3.msra.mxu0 %v322_v11 }
  0x4c   : > { %829 = vmatpush3.msra.mxu1 %v332_v20  ;;  %835 = vmatprep.subr.mxu0 %v1082_v0 }
  0x4d   : > { %831 = vmatmul.mubr.f32.vlgmr.msra.gmra.mxu1 %v282_v8  ;;  %836 = vmatpush3.msra.mxu0 %v329_v9 }
  0x4e   : > { %837 = vmatprep.mubr.msk.f32.mxu0 %vm1083_vm0, %v1082_v0  ;;  %840 = vmatprep.subr.mxu1 %v1082_v0 }
  0x4f   : > { %838 = vmatmul.mubr.f32.vlgmr.msra.gmra.mxu0 %v283_v10  ;;  %841 = vmatpush3.msra.mxu1 %v244_v7 }
  0x50   : > { %847 = vmatprep.subr.mxu0 %v1082_v0  ;;  %842 = vmatprep.subr.mxu1 %v1082_v0 }
  0x51   : > { %848 = vmatpush3.msra.mxu0 %v323_v14  ;;  %843 = vmatpush3.msra.mxu1 %v247_v5 }
  0x52   : > { %844 = vmatprep.mubr.msk.f32.mxu1 %vm1083_vm0, %v1082_v0  ;;  %849 = vmatprep.subr.mxu0 %v1082_v0 }
  0x53   : > { %845 = vmatmul.mubr.f32.vlgmr.msra.gmra.mxu1 %v284_v13  ;;  %850 = vmatpush3.msra.mxu0 %v330_v12 }
  0x54   : > { %851 = vmatprep.mubr.msk.f32.mxu0 %vm1083_vm0, %v1082_v0  ;;  %854 = vmatprep.subr.mxu1 %v1082_v0 }
  0x55   : > { %852 = vmatmul.mubr.f32.vlgmr.msra.gmra.mxu0 %v282_v8  ;;  %855 = vmatpush3.msra.mxu1 %v244_v7 }
  0x56   : > { %856 = vmatprep.subr.mxu1 %v1082_v0  ;;  %858 = vmatprep.mubr.msk.f32.mxu1 %vm1083_vm0, %v1082_v0 }
  0x57   : > { %857 = vmatpush3.msra.mxu1 %v247_v5 }
  0x58   : > { %859 = vmatmul.mubr.f32.vlgmr.msra.gmra.mxu1 %v282_v8 }
 0x10a   : > { %v288_v21 = vpop.f32.mrf.mxu0 }
 0x10c   : > { %v825_v22 = vpop.f32.mrf.mxu0 }
 0x10d   : > { %v369_v23 = vpop.f32.mrf.mxu1 }
 0x10e   : > { %v370_v24 = vadd.f32 %v369_v23, %v288_v21 }
 0x10f   : > { %v445_v25 = vpop.f32.mrf.mxu0  ;;  %v832_v26 = vpop.f32.mrf.mxu1 }
 0x110   : > { %v446_v27 = vadd.f32 %v445_v25, %v370_v24 }
 0x111   : > { %v839_v28 = vpop.f32.mrf.mxu0 }
 0x113   : > { %v520_v29 = vpop.f32.mrf.mxu1 }
 0x114   : > { %v521_v30 = vadd.f32 %v520_v29, %v446_v27 }
 0x115   : > { %v597_v31 = vpop.f32.mrf.mxu0  ;;  %v846_v32 = vpop.f32.mrf.mxu1 }
 0x116   : > { %v598_v33 = vadd.f32 %v597_v31, %v521_v30 }
 0x117   : > { %v853_v34 = vpop.f32.mrf.mxu0 }
 0x118   : > { %v670_v35 = vpop.f32.mrf.mxu1 }
 0x119   : > { %v671_v36 = vadd.f32 %v670_v35, %v598_v33 }
 0x11a   : > { %v860_v37 = vpop.f32.mrf.mxu1 }
 0x11b   : > { %680 = vst [vmem:[%s196_s19] sm:$0xff] %v671_v36 }
 0x11c   : > { %1005 = shalt.err (!%p1002_p5)
}
 0x11d   : > { %s1006_s29 = scalar_lea.hbm %s1241_s24, 128  ;;  %s1010_s6 = scalar_lea.hbm %s1285_s2, 256 }
 0x11e   : > { %p1007_p7 = scmp.ne.s32.totalorder %s1241_s24, %s1006_s29  ;;  %p1011_p9 = scmp.lt.s32.totalorder %s1241_s24, %s1285_s2 }
 0x11f   : > { %p1012_p11 = scmp.lt.s32.totalorder %s1010_s6, %s1006_s29 }
 0x120   : > { %p1008_p6 = pnand %p1007_p7, %p1187_p13 }
 0x121   : > { %p1013_p12 = por %p1012_p11, %p1011_p9 }
 0x122   : > { %p1009_p4 = pneg %p1008_p6 }
 0x124   : > { %p1014_p1 = pnand %p1013_p12, %p1009_p4 }
 0x126   : > { %1017 = shalt.err (!%p1014_p1)
}
 0x127   : > { %867 = dma.vmem_to_hbm [thread:$0]  (%p1187_p13), %s696_s21, 128, %s1241_s24, %s682_s26  }
 0x128 PF: > { %s707_s8 = sand.u32 1, %s1056_s9   ;;  %p1297_p8 = scmp.ne.s32.totalorder %s1290_s20, 0 }
 0x129   : > { %p1298_p10 = scmp.ge.s32.totalorder %s1076_s14, 2  ;;  %s708_s16 = scalar_lea.sflag [#allocation5], %s707_s8 }
 0x12b   : > { %p878_p0 = pnand %p1298_p10, %p1297_p8 }
 0x12d   : > { %p879_p2 = pneg %p878_p0 }
 0x12f   : > { %1051 = dma.done.wait (%p879_p2), %s708_s16, 128  }
 0x130   : > { %1053 = vsyncadd (%p879_p2), %s708_s16, 4294967168  ;;  %s19_s14 = sadd.s32 1, %s1076_s14   ;;  %s1299_s9 = smov %s1060_s10 }
 0x131   : > { %p16_p3 = scmp.ge.s32.totalorder %s19_s14, 4   ;;  %s1300_s10 = smov %s1064_s11 }
 0x132   : > { %s1301_s11 = smov %s1196_s15  ;;  %s1302_s12 = smov %s1072_s13 }
 0x133   : > { %s1303_s13 = smov %s1305_s25  ;;  %18 = sbr.rel (!%p16_p3) target bundleno = 7 (0x7), region = 86 }
 0x138   :  { %713 = vsyncpa [#allocation4], 1 }
 0x139   :  { %715 = vsyncpa [#allocation4 + $0x1], 1 }
 0x13a   :  { %716 = vsyncpa [#allocation7], 1 }
 0x13b   :  { %717 = vsyncpa [#allocation5], 1 }
 0x13c   :  { %719 = vsyncpa [#allocation5 + $0x1], 1 }

</bundles_post_ra>
